<compile_context>
chip_gen: v7x
topology: tpu7x:2x2x1
jax: 0.10.0
libtpu: 0.0.40
codegen_flags: <defaults>
</compile_context>

<pallas_src>
import functools

import jax
import jax.numpy as jnp
from jax.experimental import pallas as pl
from jax.experimental.pallas import tpu as pltpu


def _round_up(x, m):
    return ((x + m - 1) // m) * m


def _corr2d_kernel(x_ref, halo_ref, w_ref, b_ref, o_ref, *, kh, kw):
    """One output row-tile of y = corr2d(x, w) + b.

    x_ref:    (tile_h, WP)      main input rows for this tile   (VMEM)
    halo_ref: (1, halo_h, WP)   rows just below this tile       (VMEM)
    w_ref:    (kh, kw)          kernel weights                  (SMEM)
    b_ref:    (1,)              bias                            (SMEM)
    o_ref:    (tile_h, WP)      output tile                     (VMEM)
    """
    tile_h, wp = o_ref.shape

    # Hoist all scalar (SMEM) reads out of the unrolled MAC loop so each
    # weight is read / broadcast exactly once per tile.
    w_s = [[w_ref[i, j] for j in range(kw)] for i in range(kh)]
    b_s = b_ref[0]

    # Stitch the bottom halo onto the main rows: (tile_h + halo_h, WP).
    x_full = jnp.concatenate([x_ref[...], halo_ref[0]], axis=0)

    acc = jnp.zeros((tile_h, wp), jnp.float32)
    for i in range(kh):
        # Row shift: sublane-axis slice, lanes stay aligned.
        rows = x_full[i:i + tile_h, :]
        for j in range(kw):
            # Column shift: lane rotation on the XLU (roll left by j), instead
            # of a lane-offset slice on the load path.  Wrapped lanes only end
            # up in output columns >= wo, which the wrapper crops.
            shifted = rows if j == 0 else pltpu.roll(rows, shift=wp - j, axis=1)
            acc = acc + shifted * w_s[i][j]

    o_ref[...] = acc + b_s


def conv2d_pallas(x, weight, bias, *, tile_h=256):
    """Pallas equivalent of Conv2D.forward: corr2d(x, weight) + bias."""
    h, w = x.shape
    kh, kw = weight.shape
    ho, wo = h - kh + 1, w - kw + 1

    # Output tiling: rows in multiples of 8, full padded width (multiple of
    # 128 lanes).  Padded width >= W guarantees the rolled (wrapped) lanes
    # never touch a valid output column.
    tile_h = min(tile_h, _round_up(ho, 8))
    ho_pad = _round_up(ho, tile_h)
    wp = _round_up(w, 128)
    halo_h = _round_up(max(kh - 1, 1), 8)
    n_tiles = ho_pad // tile_h

    # Zero-pad the image once; valid outputs only ever read real data.
    hp = ho_pad + halo_h
    xp = jnp.zeros((hp, wp), jnp.float32).at[:h, :w].set(x.astype(jnp.float32))
    x_main = xp[:ho_pad]
    # Pre-gather the bottom-halo rows of every tile: (n_tiles, halo_h, WP).
    halo = jnp.stack(
        [xp[(b + 1) * tile_h:(b + 1) * tile_h + halo_h] for b in range(n_tiles)]
    )

    kernel = functools.partial(_corr2d_kernel, kh=kh, kw=kw)

    out_padded = pl.pallas_call(
        kernel,
        out_shape=jax.ShapeDtypeStruct((ho_pad, wp), jnp.float32),
        grid=(n_tiles,),
        in_specs=[
            pl.BlockSpec((tile_h, wp), lambda b: (b, 0)),          # main rows
            pl.BlockSpec((1, halo_h, wp), lambda b: (b, 0, 0)),    # bottom halo
            pl.BlockSpec(memory_space=pltpu.MemorySpace.SMEM),     # weight
            pl.BlockSpec(memory_space=pltpu.MemorySpace.SMEM),     # bias
        ],
        out_specs=pl.BlockSpec((tile_h, wp), lambda b: (b, 0)),
        compiler_params=pltpu.CompilerParams(
            dimension_semantics=("parallel",),
            vmem_limit_bytes=32 * 1024 * 1024,
        ),
    )(x_main, halo, weight.astype(jnp.float32), bias.astype(jnp.float32))

    return out_padded[:ho, :wo]


def _corr2d_ref(x, k):
    """Pure-JAX reference of the PyTorch corr2d (for a sanity check)."""
    kh, kw = k.shape
    ho, wo = x.shape[0] - kh + 1, x.shape[1] - kw + 1
    out = jnp.zeros((ho, wo), jnp.float32)
    for i in range(kh):
        for j in range(kw):
            out = out + x[i:i + ho, j:j + wo] * k[i, j]
    return out


if __name__ == "__main__":
    key = jax.random.PRNGKey(0)
    kx, kw_key, kx2, kw2_key = jax.random.split(key, 4)

    # Case 1: shapes from the reference script — x (6, 8), kernel (1, 2),
    # weight ~ U[0,1), bias = zeros(1), exactly like Conv2D.__init__/forward.
    H, W = 6, 8
    kernel_size = (1, 2)
    x = jax.random.normal(kx, (H, W), dtype=jnp.float32)
    weight = jax.random.uniform(kw_key, kernel_size, dtype=jnp.float32)
    bias = jnp.zeros((1,), dtype=jnp.float32)

    out = conv2d_pallas(x, weight, bias)
    jax.block_until_ready(out)
    ref = _corr2d_ref(x, weight) + bias[0]
    assert out.shape == (H - kernel_size[0] + 1, W - kernel_size[1] + 1)
    assert jnp.allclose(out, ref, atol=1e-5, rtol=1e-5)

    # Case 2: exercise the general path — multi-tile grid, row halo (kh > 1)
    # and column roll (kw > 1).
    H2, W2 = 37, 50
    x2 = jax.random.normal(kx2, (H2, W2), dtype=jnp.float32)
    weight2 = jax.random.uniform(kw2_key, (3, 4), dtype=jnp.float32)
    bias2 = jnp.full((1,), 0.25, dtype=jnp.float32)
    out2 = conv2d_pallas(x2, weight2, bias2, tile_h=8)
    jax.block_until_ready(out2)
    ref2 = _corr2d_ref(x2, weight2) + bias2[0]
    assert out2.shape == ref2.shape
    assert jnp.allclose(out2, ref2, atol=1e-4, rtol=1e-4)

    print("KERNEL_OK")
</pallas_src>

<mosaic_0001>
module attributes {stable_mosaic.version = 11 : i64} {
  func.func @_corr2d_kernel(%arg0: i32, %arg1: memref<8x128xf32, #tpu.memory_space<vmem>>, %arg2: memref<1x8x128xf32, #tpu.memory_space<vmem>>, %arg3: memref<1x2xf32, #tpu.memory_space<smem>>, %arg4: memref<1xf32, #tpu.memory_space<smem>>, %arg5: memref<8x128xf32, #tpu.memory_space<vmem>>) attributes {dimension_semantics = [#tpu.dimension_semantics<parallel>], iteration_bounds = array<i64: 1>, scalar_prefetch = 0 : i64, scratch_operands = 0 : i64, tpu.core_type = #tpu.core_type<tc>, window_params = [{transform_indices = @transform_0, window_bounds = array<i64: 8, 128>}, {transform_indices = @transform_1, window_bounds = array<i64: 1, 8, 128>}, {transform_indices = @transform_2, window_bounds = array<i64: 1, 2>}, {transform_indices = @transform_3, window_bounds = array<i64: 1>}, {transform_indices = @transform_4, window_bounds = array<i64: 8, 128>}]} {
    %c0 = arith.constant 0 : index
    %c0_0 = arith.constant 0 : index
    %0 = memref.load %arg3[%c0, %c0_0] : memref<1x2xf32, #tpu.memory_space<smem>>
    %c0_1 = arith.constant 0 : index
    %c1 = arith.constant 1 : index
    %1 = memref.load %arg3[%c0_1, %c1] : memref<1x2xf32, #tpu.memory_space<smem>>
    %c0_2 = arith.constant 0 : index
    %2 = memref.load %arg4[%c0_2] : memref<1xf32, #tpu.memory_space<smem>>
    %c0_3 = arith.constant 0 : index
    %c0_4 = arith.constant 0 : index
    %3 = vector.load %arg1[%c0_3, %c0_4] : memref<8x128xf32, #tpu.memory_space<vmem>>, vector<8x128xf32>
    %c0_5 = arith.constant 0 : index
    %c0_6 = arith.constant 0 : index
    %c0_7 = arith.constant 0 : index
    %4 = vector.load %arg2[%c0_5, %c0_6, %c0_7] : memref<1x8x128xf32, #tpu.memory_space<vmem>>, vector<1x8x128xf32>
    %5 = vector.shape_cast %4 : vector<1x8x128xf32> to vector<8x128xf32>
    %6 = tpu.concatenate %3, %5 in 0 : vector<8x128xf32>, vector<8x128xf32> -> vector<16x128xf32>
    %cst = arith.constant 0.000000e+00 : f32
    %7 = vector.broadcast %cst : f32 to vector<8x128xf32>
    %8 = vector.extract_strided_slice %6 {offsets = [0, 0], sizes = [8, 128], strides = [1, 1]} : vector<16x128xf32> to vector<8x128xf32>
    %9 = vector.broadcast %0 : f32 to vector<8x128xf32>
    %10 = arith.mulf %8, %9 : vector<8x128xf32>
    %11 = arith.addf %7, %10 : vector<8x128xf32>
    %c127_i32 = arith.constant 127 : i32
    %12 = tpu.dynamic_rotate %8 by %c127_i32 dim 1 : vector<8x128xf32>, i32 -> vector<8x128xf32>
    %13 = vector.broadcast %1 : f32 to vector<8x128xf32>
    %14 = arith.mulf %12, %13 : vector<8x128xf32>
    %15 = arith.addf %11, %14 : vector<8x128xf32>
    %16 = vector.broadcast %2 : f32 to vector<8x128xf32>
    %17 = arith.addf %15, %16 : vector<8x128xf32>
    %c0_8 = arith.constant 0 : index
    %c0_9 = arith.constant 0 : index
    %18 = vector.load %arg5[%c0_8, %c0_9] : memref<8x128xf32, #tpu.memory_space<vmem>>, vector<8x128xf32>
    tpu.vector_store %arg5[%c0_8, %c0_9], %17 {strides = array<i32>} : memref<8x128xf32, #tpu.memory_space<vmem>>, vector<8x128xf32>,
    return
  }
  func.func @transform_0(%arg0: i32) -> (i32, i32) {
    %c0_i32 = arith.constant 0 : i32
    %c0_i32_0 = arith.constant 0 : i32
    return %arg0, %c0_i32 : i32, i32
  }
  func.func @transform_1(%arg0: i32) -> (i32, i32, i32) {
    %c0_i32 = arith.constant 0 : i32
    %c0_i32_0 = arith.constant 0 : i32
    %c0_i32_1 = arith.constant 0 : i32
    return %arg0, %c0_i32, %c0_i32_0 : i32, i32, i32
  }
  func.func @transform_2(%arg0: i32) -> (i32, i32) {
    %c0_i32 = arith.constant 0 : i32
    %c0_i32_0 = arith.constant 0 : i32
    %c0_i32_1 = arith.constant 0 : i32
    return %c0_i32, %c0_i32_0 : i32, i32
  }
  func.func @transform_3(%arg0: i32) -> i32 {
    %c0_i32 = arith.constant 0 : i32
    %c0_i32_0 = arith.constant 0 : i32
    return %c0_i32 : i32
  }
  func.func @transform_4(%arg0: i32) -> (i32, i32) {
    %c0_i32 = arith.constant 0 : i32
    %c0_i32_0 = arith.constant 0 : i32
    return %arg0, %c0_i32 : i32, i32
  }
}

</mosaic_0001>

<bundles_post_ra>
// kernel: tpu_custom_call.1
= control target key start
LH: loop header
LB: loop body
LE: loop exit
PB: predicated region body
PF: predicated region fallthrough
CT: control target
= control target key end

     0   :  { %10 = vsyncpa [#allocation4], 0  ;;  %s252_s0 = inlined_call_operand.hbm [shape: f32[8,128], index: 0, kind: input, shape index: {}]   ;;  %s253_s1 = inlined_call_operand.hbm [shape: f32[1,8,128], index: 1, kind: input, shape index: {}]   ;;  %s254_s2 = inlined_call_operand.vmem [shape: f32[1,2], index: 2, kind: input, shape index: {}]   ;;  %s255_s3 = inlined_call_operand.<no memory space> [shape: f32[1], index: 3, kind: input, shape index: {}]   ;;  %s256_s4 = inlined_call_operand.hbm [shape: f32[8,128], index: 4, kind: output, shape index: {}]  }
   0x1   :  { %11 = vsyncpa [#allocation8], 0 }
   0x2   :  { %12 = vsyncpa [#allocation6], 0 }
   0x3   :  { %13 = vsyncpa [#allocation5], 0  ;;  %s180_s15 = smov [#allocation3]   ;;  %s181_s17 = smov [#allocation7]  }
   0x4   :  { %s20_s16 = sshll.u32 %s180_s15, 4  ;;  %s30_s18 = sshll.u32 %s181_s17, 4  ;;  %s21_s16 = int_to_ptr.vmem [resolvable:$true] %s20_s16  ;;  %s31_s18 = int_to_ptr.vmem [resolvable:$true] %s30_s18 }
   0x5   :  { %s94_s21 = scalar_lea.hbm %s252_s0, 128 }
   0x6   :  { %p95_p0 = scmp.ne.s32.totalorder %s252_s0, %s94_s21  ;;  %p98_p1 = scmp.lt.u32.totalorder %s94_s21, %s252_s0 }
   0x8   :  { %p100_p2 = pnand %p98_p1, %p95_p0 }
   0xa   :  { %103 = shalt.err (!%p100_p2)
}
   0xb   :  { %s104_s26 = scalar_lea.vmem %s21_s16, 128  ;;  %p109_p4 = scmp.lt.s32.totalorder %s21_s16, %s21_s16 }
   0xc   :  { %p105_p3 = scmp.ne.s32.totalorder %s21_s16, %s104_s26  ;;  %p110_p5 = scmp.lt.s32.totalorder %s104_s26, %s104_s26 }
   0xe   :  { %p111_p6 = por %p110_p5, %p109_p4 }
  0x10   :  { %p112_p7 = pnand %p111_p6, %p105_p3 }
  0x12   :  { %115 = shalt.err (!%p112_p7)
}
  0x13   :  { %23 = dma.hbm_to_vmem [thread:$0]  %s252_s0, 128, %s21_s16, [#allocation4]  }
  0x14   :  { %s116_s5 = scalar_lea.hbm %s253_s1, 128 }
  0x15   :  { %p117_p8 = scmp.ne.s32.totalorder %s253_s1, %s116_s5  ;;  %p120_p9 = scmp.lt.u32.totalorder %s116_s5, %s253_s1 }
  0x17   :  { %p122_p10 = pnand %p120_p9, %p117_p8 }
  0x19   :  { %125 = shalt.err (!%p122_p10)
}
  0x1a   :  { %s126_s10 = scalar_lea.vmem %s31_s18, 128  ;;  %p131_p12 = scmp.lt.s32.totalorder %s31_s18, %s31_s18 }
  0x1b   :  { %p127_p11 = scmp.ne.s32.totalorder %s31_s18, %s126_s10  ;;  %p132_p13 = scmp.lt.s32.totalorder %s126_s10, %s126_s10 }
  0x1d   :  { %p133_p0 = por %p132_p13, %p131_p12 }
  0x1f   :  { %p134_p1 = pnand %p133_p0, %p127_p11 }
  0x21   :  { %137 = shalt.err (!%p134_p1)
}
  0x22   :  { %33 = dma.hbm_to_vmem [thread:$0]  %s253_s1, 128, %s31_s18, [#allocation8]  }
  0x23   :  { %s40_s14 = sshll.u32 %s254_s2, 4  ;;  %s41_s14 = int_to_ptr.vmem [resolvable:$true] %s40_s14 }
  0x24   :  { %s138_s15 = scalar_lea.vmem %s41_s14, 16  ;;  %p143_p3 = scmp.lt.s32.totalorder %s41_s14, %s41_s14 }
  0x25   :  { %p139_p2 = scmp.ne.s32.totalorder %s41_s14, %s138_s15  ;;  %p144_p4 = scmp.lt.s32.totalorder %s138_s15, %s138_s15 }
  0x27   :  { %p145_p5 = por %p144_p4, %p143_p3 }
  0x29   :  { %p146_p6 = pnand %p145_p5, %p139_p2 }
  0x2b   :  { %149 = shalt.err (!%p146_p6)
}
  0x2c   :  { %s182_s16 = smov [#allocation9]  }
  0x2d   :  { %43 = dma.vmem_to_smem %s41_s14, 16, %s182_s16, [#allocation6]  }
  0x2e   :  { %172 = dma.done.wait [#allocation4], 128  }
  0x2f   :  { %173 = vsyncadd [#allocation4], 4294967168 }
  0x30   :  { %174 = dma.done.wait [#allocation8], 128  }
  0x31   :  { %175 = vsyncadd [#allocation8], 4294967168 }
  0x32   :  { %176 = dma.done.wait [#allocation6], 16  }
  0x33   :  { %177 = vsyncadd [#allocation6], 4294967280 }
  0x34   :  { %55 = sfence }
  0x35   :  { %v59_v0 = vld [vmem:[#allocation3] sm:$0xff]  ;;  %s183_s1 = smov 127   ;;  %s56_s2 = sld [smem:[#allocation9]]  ;;  %v68_v6 = vstv %s255_s3 }
  0x36   :  { %63 = vrot.lane.b32.xlu0 %v59_v0, %s183_s1  ;;  %s88_s17 = sld [smem:[#allocation9 + $0x1]]  ;;  %s184_s20 = smov [#allocation10]  }
  0x37   :  { %s77_s21 = sshll.u32 %s184_s20, 4  ;;  %s78_s21 = int_to_ptr.vmem [resolvable:$true] %s77_s21 }
  0x38   :  { %s150_s22 = scalar_lea.vmem %s78_s21, 128  ;;  %p155_p8 = scmp.lt.s32.totalorder %s78_s21, %s78_s21 }
  0x39   :  { %p151_p7 = scmp.ne.s32.totalorder %s78_s21, %s150_s22  ;;  %p156_p9 = scmp.lt.s32.totalorder %s150_s22, %s150_s22 }
  0x3b   :  { %v60_v1 = vstv %s56_s2  ;;  %p157_p10 = por %p156_p9, %p155_p8 }
  0x3c   :  { %v65_v2 = vstv %s88_s17  ;;  %v61_v3 = vmul.f32 %v60_v1, %v59_v0 }
  0x3d   :  { %p158_p11 = pnand %p157_p10, %p151_p7 }
  0xa8   :  { %v64_v4 = vpop.permute.xlu0 %63 }
  0xa9   :  { %v66_v5 = vmul.f32 %v65_v2, %v64_v4 }
  0xab   :  { %v67_v7 = vadd.f32 %v66_v5, %v61_v3 }
  0xad   :  { %v69_v8 = vadd.f32 %v68_v6, %v67_v7 }
  0xaf   :  { %70 = vst [vmem:[#allocation10] sm:$0xff] %v69_v8 }
  0xb0   :  { %161 = shalt.err (!%p158_p11)
}
  0xb1   :  { %s162_s25 = scalar_lea.hbm %s256_s4, 128 }
  0xb2   :  { %p163_p12 = scmp.ne.s32.totalorder %s256_s4, %s162_s25  ;;  %p166_p13 = scmp.lt.u32.totalorder %s162_s25, %s256_s4 }
  0xb4   :  { %p168_p0 = pnand %p166_p13, %p163_p12 }
  0xb6   :  { %171 = shalt.err (!%p168_p0)
}
  0xb7   :  { %80 = dma.vmem_to_hbm [thread:$0]  %s78_s21, 128, %s256_s4, [#allocation5]  }
  0xb8   :  { %178 = dma.done.wait [#allocation5], 128  }
  0xb9   :  { %179 = vsyncadd [#allocation5], 4294967168 }
  0xba   :  { %84 = vsyncpa [#allocation4], 1 }
  0xbb   :  { %85 = vsyncpa [#allocation8], 1 }
  0xbc   :  { %86 = vsyncpa [#allocation5], 1 }
  0xbd   :  { %87 = vsyncpa [#allocation6], 1 }

</bundles_post_ra>
